<compile_context>
chip_gen: v6e
topology: v6e:2x2x1
jax: 0.10.0
libtpu: 0.0.40
codegen_flags: <defaults>
</compile_context>

<pallas_src>
import jax
import jax.numpy as jnp
from jax.experimental import pallas as pl
from jax.experimental.pallas import tpu as pltpu


# ---------------------------------------------------------------------------
# Pallas kernel: fused 1x1 conv (channel matmul) + bias, one batch element per
# grid step. Output is lane-dense: (Cout, H*W) with H*W a multiple of 128.
# ---------------------------------------------------------------------------
def conv1x1_kernel(x_ref, w_ref, b_ref, o_ref):
    # x_ref: (1, Cin, HW)   one batch element, channels x flattened spatial
    # w_ref: (Cout, Cin)    1x1 conv weights
    # b_ref: (Cout, 1)      conv bias (broadcast over spatial lanes)
    # o_ref: (1, Cout, HW)
    acc = jnp.dot(w_ref[...], x_ref[0],
                  preferred_element_type=jnp.float32)     # (Cout, HW) on MXU
    o_ref[0] = (acc + b_ref[...]).astype(o_ref.dtype)


def outconv_forward(x, w, b):
    """1x1 convolution, NCHW in / NCHW out (matches nn.Conv2d(in_ch, out_ch, 1)).

    x: (N, Cin, H, W) f32
    w: (Cout, Cin, 1, 1) f32   (PyTorch OIHW layout)
    b: (Cout,) f32
    """
    N, Cin, H, W = x.shape
    Cout = w.shape[0]
    HW = H * W

    x2 = x.reshape(N, Cin, HW)                       # contiguous reshape, free
    w2 = w.reshape(Cout, Cin).astype(jnp.float32)
    b2 = b.reshape(Cout, 1).astype(jnp.float32)

    out = pl.pallas_call(
        conv1x1_kernel,
        out_shape=jax.ShapeDtypeStruct((N, Cout, HW), jnp.float32),
        grid_spec=pltpu.PrefetchScalarGridSpec(
            num_scalar_prefetch=0,
            grid=(N,),
            in_specs=[
                pl.BlockSpec((1, Cin, HW), lambda n: (n, 0, 0)),
                pl.BlockSpec((Cout, Cin), lambda n: (0, 0)),
                pl.BlockSpec((Cout, 1), lambda n: (0, 0)),
            ],
            out_specs=pl.BlockSpec((1, Cout, HW), lambda n: (n, 0, 0)),
        ),
        compiler_params=pltpu.CompilerParams(
            dimension_semantics=("parallel",)),
    )(x2, w2, b2)

    return out.reshape(N, Cout, H, W)


# ---------------------------------------------------------------------------
# Pure-JAX reference for correctness check.
# ---------------------------------------------------------------------------
def outconv_ref(x, w, b):
    N, Cin, H, W = x.shape
    Cout = w.shape[0]
    y = jnp.einsum("oc,nchw->nohw", w.reshape(Cout, Cin), x)
    return y + b.reshape(1, Cout, 1, 1)


# ---------------------------------------------------------------------------
if __name__ == "__main__":
    key = jax.random.PRNGKey(0)
    k1, k2, k3 = jax.random.split(key, 3)

    # outconv(in_ch=8, out_ch=4), x: (N=2, C=8, H=16, W=16)  (NCHW)
    N, Cin, Cout, H, W = 2, 8, 4, 16, 16
    x = jax.random.normal(k1, (N, Cin, H, W), jnp.float32)
    w = 0.1 * jax.random.normal(k2, (Cout, Cin, 1, 1), jnp.float32)
    b = 0.05 * jax.random.normal(k3, (Cout,), jnp.float32)

    out = jax.block_until_ready(outconv_forward(x, w, b))
    ref = jax.block_until_ready(outconv_ref(x, w, b))

    assert out.shape == (N, Cout, H, W), out.shape
    assert jnp.allclose(out, ref, atol=1e-5, rtol=1e-5), float(
        jnp.max(jnp.abs(out - ref)))

    print("KERNEL_OK")
</pallas_src>

<mosaic_0001>
module attributes {stable_mosaic.version = 11 : i64} {
  func.func @conv1x1_kernel(%arg0: i32, %arg1: memref<1x8x256xf32, #tpu.memory_space<vmem>>, %arg2: memref<4x8xf32, #tpu.memory_space<vmem>>, %arg3: memref<4x1xf32, #tpu.memory_space<vmem>>, %arg4: memref<1x4x256xf32, #tpu.memory_space<vmem>>) attributes {dimension_semantics = [#tpu.dimension_semantics<parallel>], iteration_bounds = array<i64: 2>, scalar_prefetch = 0 : i64, scratch_operands = 0 : i64, tpu.core_type = #tpu.core_type<tc>, window_params = [{transform_indices = @transform_0, window_bounds = array<i64: 1, 8, 256>}, {pipeline_mode = #tpu.pipeline_mode<synchronous>, transform_indices = @transform_1, window_bounds = array<i64: 4, 8>}, {pipeline_mode = #tpu.pipeline_mode<synchronous>, transform_indices = @transform_2, window_bounds = array<i64: 4, 1>}, {transform_indices = @transform_3, window_bounds = array<i64: 1, 4, 256>}]} {
    %c0 = arith.constant 0 : index
    %c0_0 = arith.constant 0 : index
    %0 = vector.load %arg2[%c0, %c0_0] : memref<4x8xf32, #tpu.memory_space<vmem>>, vector<4x8xf32>
    %c0_1 = arith.constant 0 : index
    %c0_2 = arith.constant 0 : index
    %c0_3 = arith.constant 0 : index
    %1 = vector.load %arg1[%c0_1, %c0_2, %c0_3] : memref<1x8x256xf32, #tpu.memory_space<vmem>>, vector<1x8x256xf32>
    %2 = vector.shape_cast %1 : vector<1x8x256xf32> to vector<8x256xf32>
    %cst = arith.constant dense<0.000000e+00> : vector<4x256xf32>
    %3 = tpu.matmul %0, %2, %cst {dimension_numbers = #tpu.dot_dimension_numbers<[1], [0], [0], [1], [0, 0, 1, 1], [], []>} : vector<4x8xf32>, vector<8x256xf32>, vector<4x256xf32> -> vector<4x256xf32>
    %c0_4 = arith.constant 0 : index
    %c0_5 = arith.constant 0 : index
    %4 = vector.load %arg3[%c0_4, %c0_5] : memref<4x1xf32, #tpu.memory_space<vmem>>, vector<4x1xf32>
    %5 = vector.broadcast %4 : vector<4x1xf32> to vector<4x256xf32>
    %6 = arith.addf %3, %5 : vector<4x256xf32>
    %c0_6 = arith.constant 0 : index
    %c0_7 = arith.constant 0 : index
    %c0_8 = arith.constant 0 : index
    %7 = vector.load %arg4[%c0_6, %c0_7, %c0_8] : memref<1x4x256xf32, #tpu.memory_space<vmem>>, vector<1x4x256xf32>
    %8 = vector.shape_cast %7 : vector<1x4x256xf32> to vector<4x256xf32>
    %9 = vector.shape_cast %6 : vector<4x256xf32> to vector<1x4x256xf32>
    tpu.vector_store %arg4[%c0_6, %c0_7, %c0_8], %9 {strides = array<i32>} : memref<1x4x256xf32, #tpu.memory_space<vmem>>, vector<1x4x256xf32>,
    return
  }
  func.func @transform_0(%arg0: i32) -> (i32, i32, i32) {
    %c0_i32 = arith.constant 0 : i32
    %c0_i32_0 = arith.constant 0 : i32
    %c0_i32_1 = arith.constant 0 : i32
    return %arg0, %c0_i32, %c0_i32_0 : i32, i32, i32
  }
  func.func @transform_1(%arg0: i32) -> (i32, i32) {
    %c0_i32 = arith.constant 0 : i32
    %c0_i32_0 = arith.constant 0 : i32
    %c0_i32_1 = arith.constant 0 : i32
    return %c0_i32, %c0_i32_0 : i32, i32
  }
  func.func @transform_2(%arg0: i32) -> (i32, i32) {
    %c0_i32 = arith.constant 0 : i32
    %c0_i32_0 = arith.constant 0 : i32
    %c0_i32_1 = arith.constant 0 : i32
    return %c0_i32, %c0_i32_0 : i32, i32
  }
  func.func @transform_3(%arg0: i32) -> (i32, i32, i32) {
    %c0_i32 = arith.constant 0 : i32
    %c0_i32_0 = arith.constant 0 : i32
    %c0_i32_1 = arith.constant 0 : i32
    return %arg0, %c0_i32, %c0_i32_0 : i32, i32, i32
  }
}

</mosaic_0001>

<bundles_post_ra>
// kernel: tpu_custom_call.1
= control target key start
LH: loop header
LB: loop body
LE: loop exit
PB: predicated region body
PF: predicated region fallthrough
CT: control target
= control target key end

     0   :  { %8 = vsyncpa [#allocation3], 0  ;;  %s693_s0 = inlined_call_operand.hbm [shape: f32[2,8,256], index: 0, kind: input, shape index: {}]   ;;  %s694_s1 = inlined_call_operand.vmem [shape: f32[4,8], index: 1, kind: input, shape index: {}]   ;;  %s695_s2 = inlined_call_operand.vmem [shape: f32[4,1], index: 2, kind: input, shape index: {}]   ;;  %s696_s3 = inlined_call_operand.hbm [shape: f32[2,4,256], index: 3, kind: output, shape index: {}]  }
   0x1   :  { %10 = vsyncpa [#allocation3 + $0x1], 0 }
   0x2   :  { %11 = vsyncpa [#allocation4], 0 }
   0x3   :  { %13 = vsyncpa [#allocation4 + $0x1], 0  ;;  %s545_s12 = smov 0   ;;  %s547_s13 = smov 0  }
   0x4   :  { %s549_s14 = smov 0   ;;  %s551_s15 = smov 0  }
   0x5 LB: > { %s566_s16 = sadd.s32 4294967295, %s519_s15   ;;  %s361_s17 = sadd.s32 4294967294, %s519_s15   ;;  %s519_s15 = sphi %s551_s15, %s713_s15   ;;  %s515_s14 = sphi %s549_s14, %s712_s14   ;;  %s511_s13 = sphi %s547_s13, %s711_s13   ;;  %s507_s12 = sphi %s545_s12, %s710_s12  }
   0x6   : > { %s570_s18 = sadd.s32 1, %s519_s15   ;;  %s26_s19 = sadd.s32 1, %s515_s14 }
   0x7   : > { %s23_s20 = ssub.s32 %s519_s15, %s570_s18  ;;  %p33_p0 = scmp.ne.s32.totalorder %s515_s14, %s511_s13 }
   0x8   : > { %p24_p1 = scmp.eq.s32.totalorder %s23_s20, 0  ;;  %p34_p2 = scmp.eq.s32.totalorder %s519_s15, 0 }
   0x9   : > { %p39_p3 = scmp.ne.s32.totalorder %s511_s13, %s507_s12  ;;  %p40_p4 = scmp.eq.s32.totalorder %s566_s16, 0 }
   0xa   : > { %s582_s21 = scalar_select %p24_p1, %s515_s14, %s26_s19  }
   0xb   : > { %p584_p5 = por %p34_p2, %p33_p0  ;;  %p588_p6 = por %p40_p4, %p39_p3 }
   0xc   : > { %p105_p7 = scmp.eq.s32.totalorder %s566_s16, 1  ;;  %p111_p8 = scmp.eq.s32.totalorder %s361_s17, 1 }
   0xd   : > { %s700_s23 = scalar_select %p588_p6, 1, 0 }
   0xe   : > { %p390_p10 = scmp.lt.s32.totalorder %s519_s15, 2  ;;  %p595_p11 = por %p105_p7, %p33_p0 }
   0xf   : > { %p599_p12 = por %p111_p8, %p39_p3  ;;  %s137_s26 = sand.u32 1, %s515_s14  }
  0x10   : > { %s701_s24 = scalar_select %p595_p11, 1, 0 }
  0x11   : > { %s702_s25 = scalar_select %p599_p12, 1, 0 }
  0x12   : > { %s376_s27 = sshll.u32 %s519_s15, 8  ;;  %s364_s28 = sshll.u32 %s137_s26, 4 }
  0x13   : > { %s608_s4 = scalar_lea.hbm %s693_s0, %s376_s27  ;;  %s141_s5 = scalar_lea.vmem [#allocation2], %s364_s28 }
  0x14   : > { %s149_s6 = sshll.u32 %s141_s5, 4  ;;  %p612_p13 = pnand %p390_p10, %p584_p5  ;;  %s616_s6 = int_to_ptr.vmem [resolvable:$true] %s149_s6 }
  0x15   : > { %s138_s8 = scalar_lea.sflag [#allocation3], %s137_s26  ;;  %s427_s9 = scalar_lea.hbm %s608_s4, 256 }
  0x16   : > { %p428_p2 = scmp.ne.s32.totalorder %s608_s4, %s427_s9  ;;  %p429_p3 = pneg %p612_p13 }
  0x17   : > { %s432_s17 = scalar_lea.hbm %s693_s0, 512  ;;  %p433_p5 = scmp.lt.s32.totalorder %s608_s4, %s693_s0 }
  0x18   : > { %p430_p4 = pnand %p429_p3, %p428_p2  ;;  %p434_p8 = scmp.lt.s32.totalorder %s432_s17, %s427_s9 }
  0x1a   : > { %p431_p7 = pneg %p430_p4  ;;  %p435_p10 = por %p434_p8, %p433_p5 }
  0x1c   : > { %p436_p9 = pnand %p435_p10, %p431_p7 }
  0x1e   : > { %439 = shalt.err (!%p436_p9)
}
  0x1f   : > { %s440_s22 = scalar_lea.vmem %s616_s6, 256  ;;  %s521_s26 = smov [#allocation2]  }
  0x20   : > { %p441_p0 = scmp.ne.s32.totalorder %s616_s6, %s440_s22  ;;  %s445_s27 = sshll.u32 %s521_s26, 4  ;;  %s446_s27 = int_to_ptr.vmem [resolvable:$false] %s445_s27 }
  0x21   : > { %s447_s28 = scalar_lea.vmem %s446_s27, 512  ;;  %p448_p4 = scmp.lt.s32.totalorder %s616_s6, %s446_s27 }
  0x22   : > { %p443_p1 = pnand %p441_p0, %p429_p3  ;;  %p449_p12 = scmp.lt.s32.totalorder %s447_s28, %s440_s22 }
  0x24   : > { %p444_p2 = pneg %p443_p1  ;;  %p450_p11 = por %p449_p12, %p448_p4 }
  0x26   : > { %p451_p6 = pnand %p450_p11, %p444_p2 }
  0x28   : > { %454 = shalt.err (!%p451_p6)
}
  0x29   : > { %385 = dma.hbm_to_vmem [thread:$0]  (!%p612_p13), %s608_s4, 256, %s616_s6, %s138_s8  }
  0x2a   : > { %p704_p9 = scmp.lt.s32.totalorder %s519_s15, 3  ;;  %p705_p7 = scmp.ge.s32.totalorder %s519_s15, 1 }
  0x2c   : > { %p155_p0 = pnand %p705_p7, %p704_p9 }
  0x2d   : > { %s643_s29 = sand.u32 (!%p155_p0), 1, %s511_s13   ;;  %p706_p6 = scmp.ne.s32.totalorder (!%p155_p0), %s700_s23, 0 }
  0x2e   : > { %158 = sbr.rel (%p155_p0) target bundleno = 268 (0x10c), region = 32  ;;  %s368_s30 = sshll.u32 (!%p155_p0), %s643_s29, 4 }
  0x2f   : > { %s161_s5 = scalar_lea.sflag (!%p155_p0), [#allocation3], %s643_s29  ;;  %s164_s9 = scalar_lea.vmem (!%p155_p0), [#allocation2], %s368_s30 }
  0x33   : > { %498 = dma.done.wait (%p706_p6), %s161_s5, 256  }
  0x34   : > { %500 = vsyncadd (%p706_p6), %s161_s5, 4294967040  ;;  %v522_v0 = vmov 0.0   ;;  %v523_v1 = vmov 0   ;;  %v189_v2 = vld [vmem:[%s164_s9 + $0x8] sm:$0xff]  ;;  %v188_v3 = vld [vmem:[%s164_s9] sm:$0xff]  ;;  %vm196_vm0 = vcmask 64512  }
  0x35   : > { %264 = vmatprep.mubr.f32.mxu0 %v522_v0  ;;  %426 = vset.pattern.permute.xlu0 %v523_v1  ;;  %v187_v4 = vld [vmem:[%s694_s1] sm:$0xf]  ;;  %s369_s23 = sshll.u32 %s643_s29, 3  ;;  %s377_s10 = sshll.u32 %s566_s16, 7 }
  0x36   : > { %230 = vmatprep.subr.mxu0 %v189_v2  ;;  %v190_v5 = vld [vmem:[%s695_s2] sm:$0xf]  ;;  %s186_s11 = scalar_lea.vmem [#allocation5], %s369_s23  ;;  %s289_s22 = scalar_lea.hbm %s696_s3, %s377_s10 }
  0x37   : > { %231 = vmatpush1.msra.mxu0 %v188_v3  ;;  %193 = vperm.xlu0 %426, %v190_v5   ;;  %s291_s17 = sshll.u32 %s186_s11, 4  ;;  %s277_s26 = scalar_lea.sflag [#allocation4], %s643_s29  ;;  %s292_s17 = int_to_ptr.vmem [resolvable:$true] %s291_s17 }
  0x38   : > { %370 = vmatmul.mubr.msk.f32.vlgmr.msra.gmra.mxu0 %vm196_vm0, %v187_v4  ;;  %s455_s27 = scalar_lea.vmem %s292_s17, 128  ;;  %p707_p12 = scmp.ne.s32.totalorder %s701_s24, 0 }
  0x39   : > { %p456_p11 = scmp.ne.s32.totalorder %s292_s17, %s455_s27  ;;  %s524_s28 = smov [#allocation5]  }
  0x3a   : > { %s459_s30 = sshll.u32 %s524_s28, 4  ;;  %s460_s30 = int_to_ptr.vmem [resolvable:$false] %s459_s30 }
  0x3b   : > { %p457_p13 = pnand %p456_p11, %p707_p12  ;;  %s461_s16 = scalar_lea.vmem %s460_s30, 256 }
  0x3c   : > { %p462_p3 = scmp.lt.s32.totalorder %s292_s17, %s460_s30  ;;  %p463_p5 = scmp.lt.s32.totalorder %s461_s16, %s455_s27 }
  0x3d   : > { %p458_p1 = pneg %p457_p13 }
  0x3e   : > { %p464_p8 = por %p463_p5, %p462_p3 }
  0x40   : > { %p465_p10 = pnand %p464_p8, %p458_p1 }
  0xb2   : > { %v194_v6 = vpop.permute.xlu0 %193 }
  0xf8   : > { %v266_v7 = vpop.f32.mrf.mxu0 }
  0xf9   : > { %v267_v9 = vadd.f32 %v266_v7, %v194_v6 }
  0xfa   : > { %v268_v8 = vpop.f32.mrf.mxu0 }
  0xfb   : > { %v269_v10 = vadd.f32 %v268_v8, %v194_v6 }
  0xfd   : > { %v273_v11 = vcombine.low %v267_v9, %v269_v10 }
  0xff   : > { %275 = vst [vmem:[%s186_s11] sm:$0xff] %v273_v11 }
 0x100   : > { %468 = shalt.err (!%p465_p10)
}
 0x101   : > { %s469_s5 = scalar_lea.hbm %s289_s22, 128  ;;  %s473_s4 = scalar_lea.hbm %s696_s3, 256 }
 0x102   : > { %p470_p2 = scmp.ne.s32.totalorder %s289_s22, %s469_s5  ;;  %p474_p7 = scmp.lt.s32.totalorder %s289_s22, %s696_s3 }
 0x103   : > { %p475_p0 = scmp.lt.s32.totalorder %s473_s4, %s469_s5 }
 0x104   : > { %p471_p4 = pnand %p470_p2, %p707_p12 }
 0x105   : > { %p476_p6 = por %p475_p0, %p474_p7 }
 0x106   : > { %p472_p9 = pneg %p471_p4 }
 0x108   : > { %p477_p11 = pnand %p476_p6, %p472_p9 }
 0x10a   : > { %480 = shalt.err (!%p477_p11)
}
 0x10b   : > { %380 = dma.vmem_to_hbm [thread:$0]  (%p707_p12), %s292_s17, 128, %s289_s22, %s277_s26  }
 0x10c PF: > { %s303_s8 = sand.u32 1, %s507_s12   ;;  %p708_p13 = scmp.ne.s32.totalorder %s702_s25, 0 }
 0x10d   : > { %p709_p1 = scmp.ge.s32.totalorder %s519_s15, 2  ;;  %s304_s23 = scalar_lea.sflag [#allocation4], %s303_s8 }
 0x10f   : > { %p387_p3 = pnand %p709_p1, %p708_p13 }
 0x111   : > { %p388_p5 = pneg %p387_p3 }
 0x113   : > { %502 = dma.done.wait (%p388_p5), %s304_s23, 128  }
 0x114   : > { %504 = vsyncadd (%p388_p5), %s304_s23, 4294967168  ;;  %p16_p8 = scmp.ge.s32.totalorder %s570_s18, 4   ;;  %s710_s12 = smov %s511_s13 }
 0x115   : > { %s711_s13 = smov %s515_s14  ;;  %s712_s14 = smov %s582_s21 }
 0x116   : > { %s713_s15 = smov %s570_s18  ;;  %18 = sbr.rel (!%p16_p8) target bundleno = 5 (0x5), region = 77 }
 0x11b   :  { %309 = vsyncpa [#allocation3], 1 }
 0x11c   :  { %311 = vsyncpa [#allocation3 + $0x1], 1 }
 0x11d   :  { %312 = vsyncpa [#allocation4], 1 }
 0x11e   :  { %314 = vsyncpa [#allocation4 + $0x1], 1 }

</bundles_post_ra>
